<compile_context>
chip_gen: v6e
topology: v6e:2x2x1
jax: 0.10.0
libtpu: 0.0.40
codegen_flags: <defaults>
</compile_context>

<pallas_src>
import jax
import jax.numpy as jnp
from jax.experimental import pallas as pl
from jax.experimental.pallas import tpu as pltpu


def _round_up(x, m):
    return ((x + m - 1) // m) * m


# ----------------------------------------------------------------------------
# Kernel: both Linear layers + ReLU + Sigmoid fused for one batch tile.
#   z (f32, cast to bf16 in-kernel), W1/W2 (bf16, (in, out) layout, hidden
#   dim lane-padded), b1/b2 (f32).  MXU accumulates in f32.
# ----------------------------------------------------------------------------
def decoder_kernel(z_ref, w1_ref, b1_ref, w2_ref, b2_ref, out_ref):
    # FFN1: (tb, L) @ (L, Hp) -> f32 accum, then bias + ReLU in f32.
    z = z_ref[...].astype(jnp.bfloat16)
    h = jnp.dot(z, w1_ref[...], preferred_element_type=jnp.float32)
    h = jnp.maximum(h + b1_ref[...], 0.0)
    # FFN2: bf16 activations into the MXU, f32 accumulation.
    o = jnp.dot(h.astype(jnp.bfloat16), w2_ref[...],
                preferred_element_type=jnp.float32)
    o = o + b2_ref[...]
    out_ref[...] = jax.nn.sigmoid(o).astype(out_ref.dtype)


# ----------------------------------------------------------------------------
# One-time parameter prep: pad the hidden (contracting) dim to a multiple of
# 128 and cast weights to bf16.  Output dim (784) is NOT padded -- the kernel
# writes the true width.  Zero-padded hidden columns give relu(0)=0 and
# contribute nothing to layer 2.
# ----------------------------------------------------------------------------
def prepare_params(w1_t, b1, w2_t, b2, *, lane=128):
    L, H = w1_t.shape
    _, O = w2_t.shape
    H_pad = _round_up(H, lane)
    w1p = jnp.zeros((L, H_pad), jnp.bfloat16).at[:, :H].set(
        w1_t.astype(jnp.bfloat16))
    b1p = jnp.zeros((1, H_pad), jnp.float32).at[:, :H].set(
        b1.reshape(1, H).astype(jnp.float32))
    w2p = jnp.zeros((H_pad, O), jnp.bfloat16).at[:H, :].set(
        w2_t.astype(jnp.bfloat16))
    b2p = b2.reshape(1, O).astype(jnp.float32)
    return w1p, b1p, w2p, b2p


def decoder_forward(z, w1p, b1p, w2p, b2p, *, tile_b=1024,
                    out_dtype=jnp.bfloat16):
    """z: (B, latent) float32.  Returns (B, output_dim) in out_dtype."""
    B, L = z.shape
    H_pad = w1p.shape[1]
    O = w2p.shape[1]

    # Batch tile: multiple of 8, capped at tile_b, and sized so the grid has
    # >= 2 steps whenever B allows (v7x: shard batch across both TCs).
    half = _round_up(pl.cdiv(_round_up(B, 8), 2), 8)
    tb = max(8, min(tile_b, half))
    grid = pl.cdiv(B, tb)          # partial last block handled by Pallas

    out_bytes = B * O * jnp.dtype(out_dtype).itemsize
    cost = pl.CostEstimate(
        flops=2 * B * (L * H_pad + H_pad * O),
        transcendentals=B * O,                     # sigmoid
        bytes_accessed=(B * L * z.dtype.itemsize
                        + w1p.size * 2 + w2p.size * 2
                        + b1p.size * 4 + b2p.size * 4
                        + out_bytes),
    )

    return pl.pallas_call(
        decoder_kernel,
        out_shape=jax.ShapeDtypeStruct((B, O), out_dtype),
        grid_spec=pltpu.PrefetchScalarGridSpec(
            num_scalar_prefetch=0,
            grid=(grid,),
            in_specs=[
                pl.BlockSpec((tb, L), lambda i: (i, 0)),        # z tile
                pl.BlockSpec((L, H_pad), lambda i: (0, 0)),     # W1 (resident)
                pl.BlockSpec((1, H_pad), lambda i: (0, 0)),     # b1 (resident)
                pl.BlockSpec((H_pad, O), lambda i: (0, 0)),     # W2 (resident)
                pl.BlockSpec((1, O), lambda i: (0, 0)),         # b2 (resident)
            ],
            out_specs=pl.BlockSpec((tb, O), lambda i: (i, 0)),
        ),
        compiler_params=pltpu.CompilerParams(
            dimension_semantics=("parallel",),   # batch axis -> both TCs (v7x)
        ),
        cost_estimate=cost,
    )(z, w1p, b1p, w2p, b2p)


# ----------------------------------------------------------------------------
# Deterministic parameter init (mimics PyTorch nn.Linear default:
# U(-1/sqrt(fan_in), 1/sqrt(fan_in)) for weight and bias).
# Stored as (in, out) = transposed PyTorch (out, in) weight, f32 logical.
# ----------------------------------------------------------------------------
def init_params(key, latent_dim, hidden_dim, output_dim):
    k1, k2, k3, k4 = jax.random.split(key, 4)
    bound1 = 1.0 / jnp.sqrt(latent_dim)
    bound2 = 1.0 / jnp.sqrt(hidden_dim)
    w1_t = jax.random.uniform(k1, (latent_dim, hidden_dim), jnp.float32,
                              minval=-bound1, maxval=bound1)
    b1 = jax.random.uniform(k2, (1, hidden_dim), jnp.float32,
                            minval=-bound1, maxval=bound1)
    w2_t = jax.random.uniform(k3, (hidden_dim, output_dim), jnp.float32,
                              minval=-bound2, maxval=bound2)
    b2 = jax.random.uniform(k4, (1, output_dim), jnp.float32,
                            minval=-bound2, maxval=bound2)
    return w1_t, b1, w2_t, b2


def _reference(z, w1_t, b1, w2_t, b2):
    return jax.nn.sigmoid(jnp.maximum(z @ w1_t + b1, 0.0) @ w2_t + b2)


if __name__ == "__main__":
    latent_dim, hidden_dim, output_dim = 20, 400, 784

    key = jax.random.PRNGKey(0)
    k_z, k_z2, k_p = jax.random.split(key, 3)
    w1_t, b1, w2_t, b2 = init_params(k_p, latent_dim, hidden_dim, output_dim)
    w1p, b1p, w2p, b2p = prepare_params(w1_t, b1, w2_t, b2)

    # Small-batch run (B=8): single grid step.
    batch = 8
    z = jax.random.normal(k_z, (batch, latent_dim), jnp.float32)
    out = decoder_forward(z, w1p, b1p, w2p, b2p)
    out = jax.block_until_ready(out)
    ref = _reference(z, w1_t, b1, w2_t, b2)
    assert out.shape == (batch, output_dim)
    # bf16 weights/activations/output -> relaxed tolerance.
    assert jnp.allclose(out.astype(jnp.float32), ref, atol=2.5e-2,
                        rtol=2.5e-2), float(jnp.max(jnp.abs(
                            out.astype(jnp.float32) - ref)))

    # Larger, non-tile-aligned batch (600): 2-step grid with a partial
    # (masked) last block -- no batch over-padding, no post-kernel slice.
    batch2 = 600
    z2 = jax.random.normal(k_z2, (batch2, latent_dim), jnp.float32)
    out2 = decoder_forward(z2, w1p, b1p, w2p, b2p)
    out2 = jax.block_until_ready(out2)
    ref2 = _reference(z2, w1_t, b1, w2_t, b2)
    assert out2.shape == (batch2, output_dim)
    assert jnp.allclose(out2.astype(jnp.float32), ref2, atol=2.5e-2,
                        rtol=2.5e-2), float(jnp.max(jnp.abs(
                            out2.astype(jnp.float32) - ref2)))

    print("KERNEL_OK")
</pallas_src>

<mosaic_0001>
module attributes {stable_mosaic.version = 11 : i64} {
  func.func @decoder_kernel(%arg0: i32, %arg1: memref<8x20xf32, #tpu.memory_space<vmem>>, %arg2: memref<20x512xbf16, #tpu.memory_space<vmem>>, %arg3: memref<1x512xf32, #tpu.memory_space<vmem>>, %arg4: memref<512x784xbf16, #tpu.memory_space<vmem>>, %arg5: memref<1x784xf32, #tpu.memory_space<vmem>>, %arg6: memref<8x784xbf16, #tpu.memory_space<vmem>>) attributes {dimension_semantics = [#tpu.dimension_semantics<parallel>], iteration_bounds = array<i64: 1>, scalar_prefetch = 0 : i64, scratch_operands = 0 : i64, tpu.core_type = #tpu.core_type<tc>, window_params = [{transform_indices = @transform_0, window_bounds = array<i64: 8, 20>}, {pipeline_mode = #tpu.pipeline_mode<synchronous>, transform_indices = @transform_1, window_bounds = array<i64: 20, 512>}, {pipeline_mode = #tpu.pipeline_mode<synchronous>, transform_indices = @transform_2, window_bounds = array<i64: 1, 512>}, {pipeline_mode = #tpu.pipeline_mode<synchronous>, transform_indices = @transform_3, window_bounds = array<i64: 512, 784>}, {pipeline_mode = #tpu.pipeline_mode<synchronous>, transform_indices = @transform_4, window_bounds = array<i64: 1, 784>}, {transform_indices = @transform_5, window_bounds = array<i64: 8, 784>}]} {
    %c0 = arith.constant 0 : index
    %c0_0 = arith.constant 0 : index
    %0 = vector.load %arg1[%c0, %c0_0] : memref<8x20xf32, #tpu.memory_space<vmem>>, vector<8x20xf32>
    %1 = arith.truncf %0 : vector<8x20xf32> to vector<8x20xbf16>
    %c0_1 = arith.constant 0 : index
    %c0_2 = arith.constant 0 : index
    %2 = vector.load %arg2[%c0_1, %c0_2] : memref<20x512xbf16, #tpu.memory_space<vmem>>, vector<20x512xbf16>
    %cst = arith.constant dense<0.000000e+00> : vector<8x512xf32>
    %3 = tpu.matmul %1, %2, %cst {dimension_numbers = #tpu.dot_dimension_numbers<[1], [0], [0], [1], [0, 0, 1, 1], [], []>} : vector<8x20xbf16>, vector<20x512xbf16>, vector<8x512xf32> -> vector<8x512xf32>
    %c0_3 = arith.constant 0 : index
    %c0_4 = arith.constant 0 : index
    %4 = vector.load %arg3[%c0_3, %c0_4] : memref<1x512xf32, #tpu.memory_space<vmem>>, vector<1x512xf32>
    %5 = vector.broadcast %4 : vector<1x512xf32> to vector<8x512xf32>
    %6 = arith.addf %3, %5 : vector<8x512xf32>
    %cst_5 = arith.constant 0.000000e+00 : f32
    %7 = vector.broadcast %cst_5 : f32 to vector<8x512xf32>
    %8 = arith.maximumf %6, %7 : vector<8x512xf32>
    %9 = arith.truncf %8 : vector<8x512xf32> to vector<8x512xbf16>
    %c0_6 = arith.constant 0 : index
    %c0_7 = arith.constant 0 : index
    %10 = vector.load %arg4[%c0_6, %c0_7] : memref<512x784xbf16, #tpu.memory_space<vmem>>, vector<512x784xbf16>
    %cst_8 = arith.constant dense<0.000000e+00> : vector<8x784xf32>
    %11 = tpu.matmul %9, %10, %cst_8 {dimension_numbers = #tpu.dot_dimension_numbers<[1], [0], [0], [1], [0, 0, 1, 1], [], []>} : vector<8x512xbf16>, vector<512x784xbf16>, vector<8x784xf32> -> vector<8x784xf32>
    %c0_9 = arith.constant 0 : index
    %c0_10 = arith.constant 0 : index
    %12 = vector.load %arg5[%c0_9, %c0_10] : memref<1x784xf32, #tpu.memory_space<vmem>>, vector<1x784xf32>
    %13 = vector.broadcast %12 : vector<1x784xf32> to vector<8x784xf32>
    %14 = arith.addf %11, %13 : vector<8x784xf32>
    %15 = arith.negf %14 : vector<8x784xf32>
    %16 = math.exp %15 : vector<8x784xf32>
    %cst_11 = arith.constant 1.000000e+00 : f32
    %17 = vector.broadcast %cst_11 : f32 to vector<8x784xf32>
    %18 = arith.addf %17, %16 : vector<8x784xf32>
    %19 = arith.divf %17, %18 : vector<8x784xf32>
    %20 = arith.truncf %19 : vector<8x784xf32> to vector<8x784xbf16>
    %c0_12 = arith.constant 0 : index
    %c0_13 = arith.constant 0 : index
    %21 = vector.load %arg6[%c0_12, %c0_13] : memref<8x784xbf16, #tpu.memory_space<vmem>>, vector<8x784xbf16>
    tpu.vector_store %arg6[%c0_12, %c0_13], %20 {strides = array<i32>} : memref<8x784xbf16, #tpu.memory_space<vmem>>, vector<8x784xbf16>,
    return
  }
  func.func @transform_0(%arg0: i32) -> (i32, i32) {
    %c0_i32 = arith.constant 0 : i32
    %c0_i32_0 = arith.constant 0 : i32
    return %arg0, %c0_i32 : i32, i32
  }
  func.func @transform_1(%arg0: i32) -> (i32, i32) {
    %c0_i32 = arith.constant 0 : i32
    %c0_i32_0 = arith.constant 0 : i32
    %c0_i32_1 = arith.constant 0 : i32
    return %c0_i32, %c0_i32_0 : i32, i32
  }
  func.func @transform_2(%arg0: i32) -> (i32, i32) {
    %c0_i32 = arith.constant 0 : i32
    %c0_i32_0 = arith.constant 0 : i32
    %c0_i32_1 = arith.constant 0 : i32
    return %c0_i32, %c0_i32_0 : i32, i32
  }
  func.func @transform_3(%arg0: i32) -> (i32, i32) {
    %c0_i32 = arith.constant 0 : i32
    %c0_i32_0 = arith.constant 0 : i32
    %c0_i32_1 = arith.constant 0 : i32
    return %c0_i32, %c0_i32_0 : i32, i32
  }
  func.func @transform_4(%arg0: i32) -> (i32, i32) {
    %c0_i32 = arith.constant 0 : i32
    %c0_i32_0 = arith.constant 0 : i32
    %c0_i32_1 = arith.constant 0 : i32
    return %c0_i32, %c0_i32_0 : i32, i32
  }
  func.func @transform_5(%arg0: i32) -> (i32, i32) {
    %c0_i32 = arith.constant 0 : i32
    %c0_i32_0 = arith.constant 0 : i32
    return %arg0, %c0_i32 : i32, i32
  }
}

</mosaic_0001>

<bundles_post_ra>
// kernel: tpu_custom_call.1
= control target key start
LH: loop header
LB: loop body
LE: loop exit
PB: predicated region body
PF: predicated region fallthrough
CT: control target
= control target key end

     0   :  { %vm86_vm0 = vcmask 1041408   ;;  %v2727_v14 = vmov 0   ;;  %vm82_vm1 = vcmask 162816   ;;  %s3519_s0 = inlined_call_operand.vmem [shape: f32[8,20], index: 0, kind: input, shape index: {}]   ;;  %s3520_s1 = inlined_call_operand.vmem [shape: bf16[20,512], index: 1, kind: input, shape index: {}]   ;;  %s3521_s2 = inlined_call_operand.vmem [shape: f32[1,512], index: 2, kind: input, shape index: {}]   ;;  %s3522_s3 = inlined_call_operand.vmem [shape: bf16[512,784], index: 3, kind: input, shape index: {}]   ;;  %s3523_s4 = inlined_call_operand.vmem [shape: f32[1,784], index: 4, kind: input, shape index: {}]   ;;  %s3524_s5 = inlined_call_operand.hbm [shape: bf16[8,784], index: 5, kind: output, shape index: {}]  }
   0x1   :  { %v28_v0 = vld [vmem:[%s3520_s1 + $0x20] sm:$0x33]  ;;  %v29_v1 = vld [vmem:[%s3520_s1 + $0x28] sm:$0x33]  ;;  %131 = vmatprep.mubr.bf16.mxu0 %v2727_v14  ;;  %172 = vmatprep.mubr.bf16.mxu1 %v2727_v14  ;;  %v2365_v19 = vld [vmem:[%s3522_s3 + $0x154] ss:$28 sps:$4 sm:$0xff]  }
   0x2   :  { %v2055_v2 = vcombine.high %v28_v0, %v28_v0  ;;  %v2057_v3 = vcombine.high %v29_v1, %v29_v1  ;;  %v2054_v4 = vcombine.low %v28_v0, %v28_v0  ;;  %v2056_v5 = vcombine.low %v29_v1, %v29_v1  ;;  %v2351_v6 = vld [vmem:[%s3520_s1 + $0x4] ss:$16 sps:$4 sm:$0xff]   ;;  %v2353_v7 = vld [vmem:[%s3520_s1 + $0xc] ss:$16 sps:$4 sm:$0xff]   ;;  %v2355_v8 = vld [vmem:[%s3520_s1] ss:$16 sps:$4 sm:$0xff]  }
   0x3   :  { %v2356_v11 = vld [vmem:[%s3520_s1 + $0x8] ss:$16 sps:$4 sm:$0xff]   ;;  %v22_v12 = vld [vmem:[%s3519_s0] sm:$0xff]  ;;  %v2368_v20 = vld [vmem:[%s3522_s3 + $0x4d4] ss:$28 sps:$4 sm:$0xff]  }
   0x4   :  { %2058 = vmatprep.subr.msk.bf16.mxu0 %vm86_vm0, %v2055_v2  ;;  %2060 = vmatprep.subr.msk.bf16.mxu1 %vm86_vm0, %v2057_v3  ;;  %v88_v9 = vsel %vm86_vm0, %v2054_v4, 0  ;;  %v94_v10 = vsel %vm86_vm0, %v2056_v5, 0  ;;  %v2359_v13 = vld [vmem:[%s3522_s3 + $0x18c] ss:$28 sps:$4 sm:$0xff]   ;;  %v23_v16 = vpack.c.bf16 %v22_v12, %v22_v12  ;;  %v2371_v23 = vld [vmem:[%s3522_s3 + $0x11c] ss:$28 sps:$4 sm:$0xff]  }
   0x5   :  { %112 = vmatpush1.bf16.msra.mxu0 %v88_v9  ;;  %153 = vmatpush1.bf16.msra.mxu1 %v94_v10  ;;  %v2362_v15 = vld [vmem:[%s3522_s3 + $0x50c] ss:$28 sps:$4 sm:$0xff]   ;;  %v2374_v24 = vld [vmem:[%s3522_s3 + $0x49c] ss:$28 sps:$4 sm:$0xff]   ;;  %v2377_v27 = vld [vmem:[%s3522_s3 + $0xe4] ss:$28 sps:$4 sm:$0xff]  }
   0x6   :  { %113 = vmatprep.subr.bf16.mxu0 %v2351_v6  ;;  %154 = vmatprep.subr.bf16.mxu1 %v2353_v7  ;;  %v2357_v17 = vld [vmem:[%s3522_s3 + $0x188] ss:$28 sps:$4 sm:$0xff]   ;;  %v2363_v21 = vld [vmem:[%s3522_s3 + $0x150] ss:$28 sps:$4 sm:$0xff]   ;;  %v2369_v25 = vld [vmem:[%s3522_s3 + $0x118] ss:$28 sps:$4 sm:$0xff]  }
   0x7   :  { %v2360_v18 = vld [vmem:[%s3522_s3 + $0x508] ss:$28 sps:$4 sm:$0xff]   ;;  %v2366_v22 = vld [vmem:[%s3522_s3 + $0x4d0] ss:$28 sps:$4 sm:$0xff]   ;;  %v2372_v26 = vld [vmem:[%s3522_s3 + $0x498] ss:$28 sps:$4 sm:$0xff]  }
   0x8   :  { %v2380_v28 = vld [vmem:[%s3522_s3 + $0x464] ss:$28 sps:$4 sm:$0xff]   ;;  %v2383_v31 = vld [vmem:[%s3522_s3 + $0xac] ss:$28 sps:$4 sm:$0xff]   ;;  %v2389_v35 = vld [vmem:[%s3522_s3 + $0x74] ss:$28 sps:$4 sm:$0xff]  }
   0x9   :  { %114 = vmatpush1.bf16.msra.mxu0 %v2355_v8  ;;  %155 = vmatpush1.bf16.msra.mxu1 %v2356_v11  ;;  %v2375_v29 = vld [vmem:[%s3522_s3 + $0xe0] ss:$28 sps:$4 sm:$0xff]   ;;  %v2386_v32 = vld [vmem:[%s3522_s3 + $0x42c] ss:$28 sps:$4 sm:$0xff]   ;;  %v2392_v36 = vld [vmem:[%s3522_s3 + $0x3f4] ss:$28 sps:$4 sm:$0xff]  }
   0xa   :  { %1634 = vmatprep.subr.bf16.mxu0 %v2359_v13  ;;  %1675 = vmatprep.subr.bf16.mxu1 %v2362_v15  ;;  %v2378_v30 = vld [vmem:[%s3522_s3 + $0x460] ss:$28 sps:$4 sm:$0xff]   ;;  %v2381_v33 = vld [vmem:[%s3522_s3 + $0xa8] ss:$28 sps:$4 sm:$0xff]   ;;  %v2387_v37 = vld [vmem:[%s3522_s3 + $0x70] ss:$28 sps:$4 sm:$0xff]  }
   0xb   :  { %v2384_v34 = vld [vmem:[%s3522_s3 + $0x428] ss:$28 sps:$4 sm:$0xff]   ;;  %v2390_v38 = vld [vmem:[%s3522_s3 + $0x3f0] ss:$28 sps:$4 sm:$0xff]   ;;  %v2395_v39 = vld [vmem:[%s3522_s3 + $0x3c] ss:$28 sps:$4 sm:$0xff]  }
   0xc   :  { %2059 = vmatmul.mubr.msk.bf16.vlgmr.msra.gmra.mxu0 %vm82_vm1, %v23_v16  ;;  %2061 = vmatmul.mubr.msk.bf16.vlgmr.msra.gmra.mxu1 %vm82_vm1, %v23_v16  ;;  %v2398_v40 = vld [vmem:[%s3522_s3 + $0x3bc] ss:$28 sps:$4 sm:$0xff]   ;;  %v2401_v43 = vld [vmem:[%s3522_s3 + $0x4] ss:$28 sps:$4 sm:$0xff]   ;;  %v2407_v47 = vld [vmem:[%s3522_s3 + $0x34c] ss:$28 sps:$4 sm:$0xff]  }
   0xd   :  { %1635 = vmatpush1.bf16.msra.mxu0 %v2357_v17  ;;  %1676 = vmatpush1.bf16.msra.mxu1 %v2360_v18  ;;  %v2393_v41 = vld [vmem:[%s3522_s3 + $0x38] ss:$28 sps:$4 sm:$0xff]   ;;  %v2404_v44 = vld [vmem:[%s3522_s3 + $0x384] ss:$28 sps:$4 sm:$0xff]   ;;  %v2410_v48 = vld [vmem:[%s3522_s3 + $0x6cc] ss:$28 sps:$4 sm:$0xff]  }
   0xe   :  { %1636 = vmatprep.subr.bf16.mxu0 %v2365_v19  ;;  %1677 = vmatprep.subr.bf16.mxu1 %v2368_v20  ;;  %v2396_v42 = vld [vmem:[%s3522_s3 + $0x3b8] ss:$28 sps:$4 sm:$0xff]   ;;  %v2399_v45 = vld [vmem:[%s3522_s3] ss:$28 sps:$4 sm:$0xff]   ;;  %v2405_v49 = vld [vmem:[%s3522_s3 + $0x348] ss:$28 sps:$4 sm:$0xff]  }
   0xf   :  { %v2402_v46 = vld [vmem:[%s3522_s3 + $0x380] ss:$28 sps:$4 sm:$0xff]   ;;  %v2408_v50 = vld [vmem:[%s3522_s3 + $0x6c8] ss:$28 sps:$4 sm:$0xff]   ;;  %v2413_v51 = vld [vmem:[%s3522_s3 + $0x314] ss:$28 sps:$4 sm:$0xff]  }
  0x10   :  { %v2416_v52 = vld [vmem:[%s3522_s3 + $0x694] ss:$28 sps:$4 sm:$0xff]   ;;  %v2419_v55 = vld [vmem:[%s3522_s3 + $0x2dc] ss:$28 sps:$4 sm:$0xff]   ;;  %v2425_v59 = vld [vmem:[%s3522_s3 + $0x2a4] ss:$28 sps:$4 sm:$0xff]  }
  0x11   :  { %1637 = vmatpush1.bf16.msra.mxu0 %v2363_v21  ;;  %1678 = vmatpush1.bf16.msra.mxu1 %v2366_v22  ;;  %v2411_v53 = vld [vmem:[%s3522_s3 + $0x310] ss:$28 sps:$4 sm:$0xff]   ;;  %v2422_v56 = vld [vmem:[%s3522_s3 + $0x65c] ss:$28 sps:$4 sm:$0xff]   ;;  %v2428_v60 = vld [vmem:[%s3522_s3 + $0x624] ss:$28 sps:$4 sm:$0xff]  }
  0x12   :  { %1638 = vmatprep.subr.bf16.mxu0 %v2371_v23  ;;  %1679 = vmatprep.subr.bf16.mxu1 %v2374_v24  ;;  %v2414_v54 = vld [vmem:[%s3522_s3 + $0x690] ss:$28 sps:$4 sm:$0xff]   ;;  %v2417_v57 = vld [vmem:[%s3522_s3 + $0x2d8] ss:$28 sps:$4 sm:$0xff]   ;;  %v2423_v61 = vld [vmem:[%s3522_s3 + $0x2a0] ss:$28 sps:$4 sm:$0xff]  }
  0x13   :  { %v2420_v58 = vld [vmem:[%s3522_s3 + $0x658] ss:$28 sps:$4 sm:$0xff]   ;;  %v2426_v62 = vld [vmem:[%s3522_s3 + $0x620] ss:$28 sps:$4 sm:$0xff]   ;;  %v2431_v63 = vld [vmem:[%s3522_s3 + $0x26c] ss:$28 sps:$4 sm:$0xff]  }
  0x14   :  { %v2434_v0 = vld [vmem:[%s3522_s3 + $0x5ec] ss:$28 sps:$4 sm:$0xff]   ;;  %v2437_v3 = vld [vmem:[%s3522_s3 + $0x234] ss:$28 sps:$4 sm:$0xff]   ;;  %v2443_v7 = vld [vmem:[%s3522_s3 + $0x1fc] ss:$28 sps:$4 sm:$0xff]  }
  0x15   :  { %1639 = vmatpush1.bf16.msra.mxu0 %v2369_v25  ;;  %1680 = vmatpush1.bf16.msra.mxu1 %v2372_v26  ;;  %v2429_v1 = vld [vmem:[%s3522_s3 + $0x268] ss:$28 sps:$4 sm:$0xff]   ;;  %v2440_v4 = vld [vmem:[%s3522_s3 + $0x5b4] ss:$28 sps:$4 sm:$0xff]   ;;  %v2446_v8 = vld [vmem:[%s3522_s3 + $0x57c] ss:$28 sps:$4 sm:$0xff]  }
  0x16   :  { %1640 = vmatprep.subr.bf16.mxu0 %v2377_v27  ;;  %1681 = vmatprep.subr.bf16.mxu1 %v2380_v28  ;;  %v2432_v2 = vld [vmem:[%s3522_s3 + $0x5e8] ss:$28 sps:$4 sm:$0xff]   ;;  %v2435_v5 = vld [vmem:[%s3522_s3 + $0x230] ss:$28 sps:$4 sm:$0xff]   ;;  %v2441_v9 = vld [vmem:[%s3522_s3 + $0x1f8] ss:$28 sps:$4 sm:$0xff]  }
  0x17   :  { %v2438_v6 = vld [vmem:[%s3522_s3 + $0x5b0] ss:$28 sps:$4 sm:$0xff]   ;;  %v2444_v10 = vld [vmem:[%s3522_s3 + $0x578] ss:$28 sps:$4 sm:$0xff]   ;;  %v2449_v11 = vld [vmem:[%s3522_s3 + $0x1c4] ss:$28 sps:$4 sm:$0xff]  }
  0x18   :  { %v2452_v12 = vld [vmem:[%s3522_s3 + $0x544] ss:$28 sps:$4 sm:$0xff]   ;;  %v2455_v15 = vld [vmem:[%s3522_s3 + $0x194] ss:$28 sps:$4 sm:$0xff]  }
  0x19   :  { %1641 = vmatpush1.bf16.msra.mxu0 %v2375_v29  ;;  %1682 = vmatpush1.bf16.msra.mxu1 %v2378_v30  ;;  %v2447_v13 = vld [vmem:[%s3522_s3 + $0x1c0] ss:$28 sps:$4 sm:$0xff]   ;;  %v2458_v16 = vld [vmem:[%s3522_s3 + $0x514] ss:$28 sps:$4 sm:$0xff]  }
  0x1a   :  { %1642 = vmatprep.subr.bf16.mxu0 %v2383_v31  ;;  %1683 = vmatprep.subr.bf16.mxu1 %v2386_v32  ;;  %v2450_v14 = vld [vmem:[%s3522_s3 + $0x540] ss:$28 sps:$4 sm:$0xff]  }
  0x1d   :  { %1643 = vmatpush1.bf16.msra.mxu0 %v2381_v33  ;;  %1684 = vmatpush1.bf16.msra.mxu1 %v2384_v34 }
  0x1e   :  { %1644 = vmatprep.subr.bf16.mxu0 %v2389_v35  ;;  %1685 = vmatprep.subr.bf16.mxu1 %v2392_v36 }
  0x21   :  { %1645 = vmatpush1.bf16.msra.mxu0 %v2387_v37  ;;  %1686 = vmatpush1.bf16.msra.mxu1 %v2390_v38 }
  0x22   :  { %1646 = vmatprep.subr.bf16.mxu0 %v2395_v39  ;;  %1687 = vmatprep.subr.bf16.mxu1 %v2398_v40 }
  0x25   :  { %1647 = vmatpush1.bf16.msra.mxu0 %v2393_v41  ;;  %1688 = vmatpush1.bf16.msra.mxu1 %v2396_v42 }
  0x26   :  { %1648 = vmatprep.subr.bf16.mxu0 %v2401_v43  ;;  %1689 = vmatprep.subr.bf16.mxu1 %v2404_v44 }
  0x29   :  { %1649 = vmatpush1.bf16.msra.mxu0 %v2399_v45  ;;  %1690 = vmatpush1.bf16.msra.mxu1 %v2402_v46 }
  0x2a   :  { %1650 = vmatprep.subr.bf16.mxu0 %v2407_v47  ;;  %1691 = vmatprep.subr.bf16.mxu1 %v2410_v48 }
  0x2d   :  { %1651 = vmatpush2.bf16.msra.mxu0 %v2405_v49  ;;  %1692 = vmatpush2.bf16.msra.mxu1 %v2408_v50 }
  0x2e   :  { %1652 = vmatprep.subr.bf16.mxu0 %v2413_v51  ;;  %1693 = vmatprep.subr.bf16.mxu1 %v2416_v52 }
  0x31   :  { %1653 = vmatpush2.bf16.msra.mxu0 %v2411_v53  ;;  %1694 = vmatpush2.bf16.msra.mxu1 %v2414_v54 }
  0x32   :  { %1654 = vmatprep.subr.bf16.mxu0 %v2419_v55  ;;  %1695 = vmatprep.subr.bf16.mxu1 %v2422_v56 }
  0x35   :  { %1655 = vmatpush2.bf16.msra.mxu0 %v2417_v57  ;;  %1696 = vmatpush2.bf16.msra.mxu1 %v2420_v58 }
  0x36   :  { %1656 = vmatprep.subr.bf16.mxu0 %v2425_v59  ;;  %1697 = vmatprep.subr.bf16.mxu1 %v2428_v60 }
  0x39   :  { %1657 = vmatpush2.bf16.msra.mxu0 %v2423_v61  ;;  %1698 = vmatpush2.bf16.msra.mxu1 %v2426_v62 }
  0x3a   :  { %1658 = vmatprep.subr.bf16.mxu0 %v2431_v63  ;;  %1699 = vmatprep.subr.bf16.mxu1 %v2434_v0 }
  0x3d   :  { %1659 = vmatpush2.bf16.msra.mxu0 %v2429_v1  ;;  %1700 = vmatpush2.bf16.msra.mxu1 %v2432_v2 }
  0x3e   :  { %1660 = vmatprep.subr.bf16.mxu0 %v2437_v3  ;;  %1701 = vmatprep.subr.bf16.mxu1 %v2440_v4 }
  0x41   :  { %1661 = vmatpush2.bf16.msra.mxu0 %v2435_v5  ;;  %1702 = vmatpush2.bf16.msra.mxu1 %v2438_v6 }
  0x42   :  { %1662 = vmatprep.subr.bf16.mxu0 %v2443_v7  ;;  %1703 = vmatprep.subr.bf16.mxu1 %v2446_v8 }
  0x45   :  { %1663 = vmatpush2.bf16.msra.mxu0 %v2441_v9  ;;  %1704 = vmatpush2.bf16.msra.mxu1 %v2444_v10 }
  0x46   :  { %1664 = vmatprep.subr.bf16.mxu0 %v2449_v11  ;;  %1705 = vmatprep.subr.bf16.mxu1 %v2452_v12 }
  0x49   :  { %1665 = vmatpush2.bf16.msra.mxu0 %v2447_v13  ;;  %1706 = vmatpush2.bf16.msra.mxu1 %v2450_v14 }
  0x4a   :  { %1716 = vmatprep.subr.bf16.mxu0 %v2455_v15  ;;  %1757 = vmatprep.subr.bf16.mxu1 %v2458_v16 }
  0x4b   :  { %10 = vsyncpa [#allocation3], 0  ;;  %v32_v17 = vlaneseq  ;;  %v30_v21 = vld [vmem:[%s3521_s2] sm:$0xf]  ;;  %v2453_v47 = vld [vmem:[%s3522_s3 + $0x190] ss:$28 sps:$4 sm:$0xff]  }
  0x4c   :  { %v2456_v48 = vld [vmem:[%s3522_s3 + $0x510] ss:$28 sps:$4 sm:$0xff]   ;;  %v2461_v50 = vld [vmem:[%s3522_s3 + $0x15c] ss:$28 sps:$4 sm:$0xff]   ;;  %v2467_v54 = vld [vmem:[%s3522_s3 + $0x124] ss:$28 sps:$4 sm:$0xff]  }
  0x4d   :  { %v2978_v18 = vshrl.u32 %v32_v17, 7  ;;  %v2464_v51 = vld [vmem:[%s3522_s3 + $0x4dc] ss:$28 sps:$4 sm:$0xff]   ;;  %v2470_v55 = vld [vmem:[%s3522_s3 + $0x4a4] ss:$28 sps:$4 sm:$0xff]   ;;  %vm2034_vm2 = vcmask 125952  }
  0x4e   :  { %v2459_v52 = vld [vmem:[%s3522_s3 + $0x158] ss:$28 sps:$4 sm:$0xff]   ;;  %v2465_v56 = vld [vmem:[%s3522_s3 + $0x120] ss:$28 sps:$4 sm:$0xff]   ;;  %v2473_v58 = vld [vmem:[%s3522_s3 + $0xec] ss:$28 sps:$4 sm:$0xff]  }
  0x4f   :  { %v34_v19 = vsub.s32 0, %v2978_v18  ;;  %v42_v20 = vsub.s32 2, %v2978_v18  ;;  %v38_v22 = vsub.s32 1, %v2978_v18  ;;  %v46_v23 = vsub.s32 3, %v2978_v18  ;;  %v2462_v53 = vld [vmem:[%s3522_s3 + $0x4d8] ss:$28 sps:$4 sm:$0xff]  }
  0x50   :  { %v2468_v57 = vld [vmem:[%s3522_s3 + $0x4a0] ss:$28 sps:$4 sm:$0xff]   ;;  %v2476_v59 = vld [vmem:[%s3522_s3 + $0x46c] ss:$28 sps:$4 sm:$0xff]   ;;  %v2479_v62 = vld [vmem:[%s3522_s3 + $0xb4] ss:$28 sps:$4 sm:$0xff]  }
  0x51   :  { %v35_v24 = vrot.slane %v30_v21, %v34_v19  ;;  %v43_v25 = vrot.slane %v30_v21, %v42_v20  ;;  %v39_v26 = vrot.slane %v30_v21, %v38_v22  ;;  %v47_v27 = vrot.slane %v30_v21, %v46_v23  ;;  %v2471_v60 = vld [vmem:[%s3522_s3 + $0xe8] ss:$28 sps:$4 sm:$0xff]   ;;  %v2482_v63 = vld [vmem:[%s3522_s3 + $0x434] ss:$28 sps:$4 sm:$0xff]   ;;  %v2485_v2 = vld [vmem:[%s3522_s3 + $0x7c] ss:$28 sps:$4 sm:$0xff]  }
  0x52   :  { %v2474_v61 = vld [vmem:[%s3522_s3 + $0x468] ss:$28 sps:$4 sm:$0xff]   ;;  %v2477_v0 = vld [vmem:[%s3522_s3 + $0xb0] ss:$28 sps:$4 sm:$0xff]   ;;  %v2488_v3 = vld [vmem:[%s3522_s3 + $0x3fc] ss:$28 sps:$4 sm:$0xff]  }
  0x53   :  { %v2480_v1 = vld [vmem:[%s3522_s3 + $0x430] ss:$28 sps:$4 sm:$0xff]   ;;  %v2483_v4 = vld [vmem:[%s3522_s3 + $0x78] ss:$28 sps:$4 sm:$0xff]   ;;  %v2491_v6 = vld [vmem:[%s3522_s3 + $0x44] ss:$28 sps:$4 sm:$0xff]  }
  0x54   :  { %v2486_v5 = vld [vmem:[%s3522_s3 + $0x3f8] ss:$28 sps:$4 sm:$0xff]   ;;  %v2494_v7 = vld [vmem:[%s3522_s3 + $0x3c4] ss:$28 sps:$4 sm:$0xff]   ;;  %v2497_v10 = vld [vmem:[%s3522_s3 + $0xc] ss:$28 sps:$4 sm:$0xff]  }
  0x55   :  { %v2489_v8 = vld [vmem:[%s3522_s3 + $0x40] ss:$28 sps:$4 sm:$0xff]   ;;  %v2500_v11 = vld [vmem:[%s3522_s3 + $0x38c] ss:$28 sps:$4 sm:$0xff]   ;;  %v2503_v14 = vld [vmem:[%s3522_s3 + $0x354] ss:$28 sps:$4 sm:$0xff]  }
  0x56   :  { %v2492_v9 = vld [vmem:[%s3522_s3 + $0x3c0] ss:$28 sps:$4 sm:$0xff]   ;;  %v2495_v12 = vld [vmem:[%s3522_s3 + $0x8] ss:$28 sps:$4 sm:$0xff]   ;;  %v2506_v15 = vld [vmem:[%s3522_s3 + $0x6d4] ss:$28 sps:$4 sm:$0xff]  }
  0x57   :  { %v2498_v13 = vld [vmem:[%s3522_s3 + $0x388] ss:$28 sps:$4 sm:$0xff]   ;;  %v2501_v16 = vld [vmem:[%s3522_s3 + $0x350] ss:$28 sps:$4 sm:$0xff]   ;;  %v2509_v21 = vld [vmem:[%s3522_s3 + $0x31c] ss:$28 sps:$4 sm:$0xff]  }
  0x58   :  { %v2504_v17 = vld [vmem:[%s3522_s3 + $0x6d0] ss:$28 sps:$4 sm:$0xff]  }
  0xcc   :  { %v133_v28 = vpop.f32.mrf.mxu0  ;;  %v174_v29 = vpop.f32.mrf.mxu1 }
  0xcd   :  { %v134_v30 = vadd.f32 %v133_v28, %v35_v24  ;;  %v175_v31 = vadd.f32 %v174_v29, %v43_v25  ;;  %v2512_v24 = vld [vmem:[%s3522_s3 + $0x69c] ss:$28 sps:$4 sm:$0xff]   ;;  %v2518_v28 = vld [vmem:[%s3522_s3 + $0x664] ss:$28 sps:$4 sm:$0xff]  }
  0xce   :  { %v135_v32 = vpop.f32.mrf.mxu0  ;;  %v176_v33 = vpop.f32.mrf.mxu1  ;;  %v2507_v25 = vld [vmem:[%s3522_s3 + $0x318] ss:$28 sps:$4 sm:$0xff]   ;;  %v2513_v29 = vld [vmem:[%s3522_s3 + $0x2e0] ss:$28 sps:$4 sm:$0xff]  }
  0xcf   :  { %v183_v34 = vmax.f32 %v175_v31, 0.0  ;;  %v136_v35 = vadd.f32 %v135_v32, %v39_v26  ;;  %v177_v36 = vadd.f32 %v176_v33, %v47_v27  ;;  %v181_v37 = vmax.f32 %v134_v30, 0.0  ;;  %v2510_v26 = vld [vmem:[%s3522_s3 + $0x698] ss:$28 sps:$4 sm:$0xff]   ;;  %v2515_v27 = vld [vmem:[%s3522_s3 + $0x2e4] ss:$28 sps:$4 sm:$0xff]  }
  0xd0   :  { %v137_v38 = vpop.f32.mrf.mxu0  ;;  %v178_v39 = vpop.f32.mrf.mxu1  ;;  %v2516_v30 = vld [vmem:[%s3522_s3 + $0x660] ss:$28 sps:$4 sm:$0xff]   ;;  %v2521_v31 = vld [vmem:[%s3522_s3 + $0x2ac] ss:$28 sps:$4 sm:$0xff]  }
  0xd1   :  { %v182_v40 = vmax.f32 %v136_v35, 0.0  ;;  %v184_v41 = vmax.f32 %v177_v36, 0.0  ;;  %v2995_v42 = vpack.c.bf16 %v183_v34, %v183_v34  ;;  %v3007_v49 = vpack.c.bf16 %v181_v37, %v181_v37  ;;  %v2524_v32 = vld [vmem:[%s3522_s3 + $0x62c] ss:$28 sps:$4 sm:$0xff]   ;;  %v2527_v35 = vld [vmem:[%s3522_s3 + $0x274] ss:$28 sps:$4 sm:$0xff]  }
  0xd2   :  { %v138_v43 = vpop.f32.mrf.mxu0  ;;  %v179_v44 = vpop.f32.mrf.mxu1  ;;  %v2519_v33 = vld [vmem:[%s3522_s3 + $0x2a8] ss:$28 sps:$4 sm:$0xff]   ;;  %v2530_v36 = vld [vmem:[%s3522_s3 + $0x5f4] ss:$28 sps:$4 sm:$0xff]   ;;  %v2533_v39 = vld [vmem:[%s3522_s3 + $0x23c] ss:$28 sps:$4 sm:$0xff]  }
  0xd3   :  { %v2997_v45 = vpack.c.bf16 %v182_v40, %v182_v40  ;;  %v2999_v46 = vpack.c.bf16 %v184_v41, %v184_v41  ;;  %v2522_v34 = vld [vmem:[%s3522_s3 + $0x628] ss:$28 sps:$4 sm:$0xff]   ;;  %v2525_v37 = vld [vmem:[%s3522_s3 + $0x270] ss:$28 sps:$4 sm:$0xff]   ;;  %v2536_v40 = vld [vmem:[%s3522_s3 + $0x5bc] ss:$28 sps:$4 sm:$0xff]  }
  0xd4   :  { %v2528_v38 = vld [vmem:[%s3522_s3 + $0x5f0] ss:$28 sps:$4 sm:$0xff]   ;;  %v2531_v41 = vld [vmem:[%s3522_s3 + $0x238] ss:$28 sps:$4 sm:$0xff]   ;;  %v2539_v44 = vld [vmem:[%s3522_s3 + $0x204] ss:$28 sps:$4 sm:$0xff]  }
  0xd5   :  { %1666 = vmatprep.mubr.bf16.mxu0 %v2997_v45  ;;  %1707 = vmatprep.mubr.bf16.mxu1 %v2999_v46  ;;  %v2534_v43 = vld [vmem:[%s3522_s3 + $0x5b8] ss:$28 sps:$4 sm:$0xff]  }
  0xd6   :  { %1667 = vmatmul.mubr.bf16.vlgmr.msra.gmra.mxu0 %v3007_v49  ;;  %1708 = vmatmul.mubr.bf16.vlgmr.msra.gmra.mxu1 %v2995_v42 }
  0xd7   :  { %1717 = vmatpush1.bf16.msra.mxu0 %v2453_v47  ;;  %1758 = vmatpush1.bf16.msra.mxu1 %v2456_v48  ;;  %v2542_v47 = vld [vmem:[%s3522_s3 + $0x584] ss:$28 sps:$4 sm:$0xff]  }
  0xd8   :  { %1748 = vmatprep.mubr.bf16.mxu0 %v2997_v45  ;;  %1789 = vmatprep.mubr.bf16.mxu1 %v2999_v46  ;;  %v2537_v48 = vld [vmem:[%s3522_s3 + $0x200] ss:$28 sps:$4 sm:$0xff]  }
  0xd9   :  { %1718 = vmatprep.subr.bf16.mxu0 %v2461_v50  ;;  %1759 = vmatprep.subr.bf16.mxu1 %v2464_v51  ;;  %v2540_v50 = vld [vmem:[%s3522_s3 + $0x580] ss:$28 sps:$4 sm:$0xff]   ;;  %v2545_v51 = vld [vmem:[%s3522_s3 + $0x1cc] ss:$28 sps:$4 sm:$0xff]  }
  0xdb   :  { %1719 = vmatpush1.bf16.msra.mxu0 %v2459_v52  ;;  %1760 = vmatpush1.bf16.msra.mxu1 %v2462_v53  ;;  %v2548_v52 = vld [vmem:[%s3522_s3 + $0x54c] ss:$28 sps:$4 sm:$0xff]  }
  0xdc   :  { %1720 = vmatprep.subr.bf16.mxu0 %v2467_v54  ;;  %1761 = vmatprep.subr.bf16.mxu1 %v2470_v55  ;;  %v2543_v53 = vld [vmem:[%s3522_s3 + $0x1c8] ss:$28 sps:$4 sm:$0xff]   ;;  %v2551_v55 = vld [vmem:[%s3522_s3 + $0x19c] ss:$28 sps:$4 sm:$0xff]  }
  0xdd   :  { %v2546_v54 = vld [vmem:[%s3522_s3 + $0x548] ss:$28 sps:$4 sm:$0xff]  }
  0xdf   :  { %1721 = vmatpush1.bf16.msra.mxu0 %v2465_v56  ;;  %1762 = vmatpush1.bf16.msra.mxu1 %v2468_v57  ;;  %v2554_v56 = vld [vmem:[%s3522_s3 + $0x51c] ss:$28 sps:$4 sm:$0xff]  }
  0xe0   :  { %1722 = vmatprep.subr.bf16.mxu0 %v2473_v58  ;;  %1763 = vmatprep.subr.bf16.mxu1 %v2476_v59  ;;  %v2549_v57 = vld [vmem:[%s3522_s3 + $0x198] ss:$28 sps:$4 sm:$0xff]   ;;  %v2557_v59 = vld [vmem:[%s3522_s3 + $0x164] ss:$28 sps:$4 sm:$0xff]  }
  0xe1   :  { %v2552_v58 = vld [vmem:[%s3522_s3 + $0x518] ss:$28 sps:$4 sm:$0xff]  }
  0xe3   :  { %1723 = vmatpush1.bf16.msra.mxu0 %v2471_v60  ;;  %1764 = vmatpush1.bf16.msra.mxu1 %v2474_v61  ;;  %v2560_v60 = vld [vmem:[%s3522_s3 + $0x4e4] ss:$28 sps:$4 sm:$0xff]  }
  0xe4   :  { %1724 = vmatprep.subr.bf16.mxu0 %v2479_v62  ;;  %1765 = vmatprep.subr.bf16.mxu1 %v2482_v63  ;;  %v2555_v61 = vld [vmem:[%s3522_s3 + $0x160] ss:$28 sps:$4 sm:$0xff]   ;;  %v2563_v63 = vld [vmem:[%s3522_s3 + $0x12c] ss:$28 sps:$4 sm:$0xff]  }
  0xe5   :  { %v2558_v62 = vld [vmem:[%s3522_s3 + $0x4e0] ss:$28 sps:$4 sm:$0xff]  }
  0xe7   :  { %1725 = vmatpush1.bf16.msra.mxu0 %v2477_v0  ;;  %1766 = vmatpush1.bf16.msra.mxu1 %v2480_v1  ;;  %v2566_v0 = vld [vmem:[%s3522_s3 + $0x4ac] ss:$28 sps:$4 sm:$0xff]  }
  0xe8   :  { %1726 = vmatprep.subr.bf16.mxu0 %v2485_v2  ;;  %1767 = vmatprep.subr.bf16.mxu1 %v2488_v3  ;;  %v2561_v1 = vld [vmem:[%s3522_s3 + $0x128] ss:$28 sps:$4 sm:$0xff]   ;;  %v2569_v3 = vld [vmem:[%s3522_s3 + $0xf4] ss:$28 sps:$4 sm:$0xff]  }
  0xe9   :  { %v2564_v2 = vld [vmem:[%s3522_s3 + $0x4a8] ss:$28 sps:$4 sm:$0xff]  }
  0xeb   :  { %1727 = vmatpush1.bf16.msra.mxu0 %v2483_v4  ;;  %1768 = vmatpush1.bf16.msra.mxu1 %v2486_v5  ;;  %v2572_v4 = vld [vmem:[%s3522_s3 + $0x474] ss:$28 sps:$4 sm:$0xff]  }
  0xec   :  { %1728 = vmatprep.subr.bf16.mxu0 %v2491_v6  ;;  %1769 = vmatprep.subr.bf16.mxu1 %v2494_v7  ;;  %v2567_v5 = vld [vmem:[%s3522_s3 + $0xf0] ss:$28 sps:$4 sm:$0xff]   ;;  %v2575_v7 = vld [vmem:[%s3522_s3 + $0xbc] ss:$28 sps:$4 sm:$0xff]  }
  0xed   :  { %v2570_v6 = vld [vmem:[%s3522_s3 + $0x470] ss:$28 sps:$4 sm:$0xff]  }
  0xef   :  { %1729 = vmatpush1.bf16.msra.mxu0 %v2489_v8  ;;  %1770 = vmatpush1.bf16.msra.mxu1 %v2492_v9  ;;  %v2578_v8 = vld [vmem:[%s3522_s3 + $0x43c] ss:$28 sps:$4 sm:$0xff]  }
  0xf0   :  { %1730 = vmatprep.subr.bf16.mxu0 %v2497_v10  ;;  %1771 = vmatprep.subr.bf16.mxu1 %v2500_v11  ;;  %v2573_v9 = vld [vmem:[%s3522_s3 + $0xb8] ss:$28 sps:$4 sm:$0xff]   ;;  %v2581_v11 = vld [vmem:[%s3522_s3 + $0x84] ss:$28 sps:$4 sm:$0xff]  }
  0xf1   :  { %v2576_v10 = vld [vmem:[%s3522_s3 + $0x438] ss:$28 sps:$4 sm:$0xff]  }
  0xf3   :  { %1731 = vmatpush1.bf16.msra.mxu0 %v2495_v12  ;;  %1772 = vmatpush1.bf16.msra.mxu1 %v2498_v13  ;;  %v2584_v12 = vld [vmem:[%s3522_s3 + $0x404] ss:$28 sps:$4 sm:$0xff]  }
  0xf4   :  { %1732 = vmatprep.subr.bf16.mxu0 %v2503_v14  ;;  %1773 = vmatprep.subr.bf16.mxu1 %v2506_v15  ;;  %v2579_v13 = vld [vmem:[%s3522_s3 + $0x80] ss:$28 sps:$4 sm:$0xff]   ;;  %v2587_v15 = vld [vmem:[%s3522_s3 + $0x4c] ss:$28 sps:$4 sm:$0xff]  }
  0xf5   :  { %v2582_v14 = vld [vmem:[%s3522_s3 + $0x400] ss:$28 sps:$4 sm:$0xff]  }
  0xf7   :  { %1733 = vmatpush2.bf16.msra.mxu0 %v2501_v16  ;;  %1774 = vmatpush2.bf16.msra.mxu1 %v2504_v17  ;;  %v2590_v16 = vld [vmem:[%s3522_s3 + $0x3cc] ss:$28 sps:$4 sm:$0xff]  }
  0xf8   :  { %1734 = vmatprep.subr.bf16.mxu0 %v2509_v21  ;;  %1775 = vmatprep.subr.bf16.mxu1 %v2512_v24  ;;  %v2585_v17 = vld [vmem:[%s3522_s3 + $0x48] ss:$28 sps:$4 sm:$0xff]   ;;  %v2593_v24 = vld [vmem:[%s3522_s3 + $0x14] ss:$28 sps:$4 sm:$0xff]  }
  0xf9   :  { %v2588_v21 = vld [vmem:[%s3522_s3 + $0x3c8] ss:$28 sps:$4 sm:$0xff]  }
  0xfb   :  { %1735 = vmatpush2.bf16.msra.mxu0 %v2507_v25  ;;  %1776 = vmatpush2.bf16.msra.mxu1 %v2510_v26  ;;  %v2596_v25 = vld [vmem:[%s3522_s3 + $0x394] ss:$28 sps:$4 sm:$0xff]  }
  0xfc   :  { %1736 = vmatprep.subr.bf16.mxu0 %v2515_v27  ;;  %1777 = vmatprep.subr.bf16.mxu1 %v2518_v28  ;;  %v2591_v26 = vld [vmem:[%s3522_s3 + $0x10] ss:$28 sps:$4 sm:$0xff]   ;;  %v2599_v28 = vld [vmem:[%s3522_s3 + $0x35c] ss:$28 sps:$4 sm:$0xff]  }
  0xfd   :  { %v2594_v27 = vld [vmem:[%s3522_s3 + $0x390] ss:$28 sps:$4 sm:$0xff]  }
  0xff   :  { %1737 = vmatpush2.bf16.msra.mxu0 %v2513_v29  ;;  %1778 = vmatpush2.bf16.msra.mxu1 %v2516_v30  ;;  %v2602_v29 = vld [vmem:[%s3522_s3 + $0x6dc] ss:$28 sps:$4 sm:$0xff]  }
 0x100   :  { %1738 = vmatprep.subr.bf16.mxu0 %v2521_v31  ;;  %1779 = vmatprep.subr.bf16.mxu1 %v2524_v32  ;;  %v2597_v30 = vld [vmem:[%s3522_s3 + $0x358] ss:$28 sps:$4 sm:$0xff]   ;;  %v2605_v32 = vld [vmem:[%s3522_s3 + $0x324] ss:$28 sps:$4 sm:$0xff]  }
 0x101   :  { %v2600_v31 = vld [vmem:[%s3522_s3 + $0x6d8] ss:$28 sps:$4 sm:$0xff]  }
 0x103   :  { %1739 = vmatpush2.bf16.msra.mxu0 %v2519_v33  ;;  %1780 = vmatpush2.bf16.msra.mxu1 %v2522_v34  ;;  %v2608_v33 = vld [vmem:[%s3522_s3 + $0x6a4] ss:$28 sps:$4 sm:$0xff]  }
 0x104   :  { %1740 = vmatprep.subr.bf16.mxu0 %v2527_v35  ;;  %1781 = vmatprep.subr.bf16.mxu1 %v2530_v36  ;;  %v2603_v34 = vld [vmem:[%s3522_s3 + $0x320] ss:$28 sps:$4 sm:$0xff]   ;;  %v2611_v36 = vld [vmem:[%s3522_s3 + $0x2ec] ss:$28 sps:$4 sm:$0xff]  }
 0x105   :  { %v2606_v35 = vld [vmem:[%s3522_s3 + $0x6a0] ss:$28 sps:$4 sm:$0xff]  }
 0x107   :  { %1741 = vmatpush2.bf16.msra.mxu0 %v2525_v37  ;;  %1782 = vmatpush2.bf16.msra.mxu1 %v2528_v38  ;;  %v2614_v37 = vld [vmem:[%s3522_s3 + $0x66c] ss:$28 sps:$4 sm:$0xff]  }
 0x108   :  { %1742 = vmatprep.subr.bf16.mxu0 %v2533_v39  ;;  %1783 = vmatprep.subr.bf16.mxu1 %v2536_v40  ;;  %v2609_v38 = vld [vmem:[%s3522_s3 + $0x2e8] ss:$28 sps:$4 sm:$0xff]   ;;  %v2617_v40 = vld [vmem:[%s3522_s3 + $0x2b4] ss:$28 sps:$4 sm:$0xff]  }
 0x109   :  { %v2612_v39 = vld [vmem:[%s3522_s3 + $0x668] ss:$28 sps:$4 sm:$0xff]  }
 0x10b   :  { %1743 = vmatpush2.bf16.msra.mxu0 %v2531_v41  ;;  %1784 = vmatpush2.bf16.msra.mxu1 %v2534_v43  ;;  %v2620_v41 = vld [vmem:[%s3522_s3 + $0x634] ss:$28 sps:$4 sm:$0xff]  }
 0x10c   :  { %1744 = vmatprep.subr.bf16.mxu0 %v2539_v44  ;;  %1785 = vmatprep.subr.bf16.mxu1 %v2542_v47  ;;  %v2615_v43 = vld [vmem:[%s3522_s3 + $0x2b0] ss:$28 sps:$4 sm:$0xff]   ;;  %v2623_v47 = vld [vmem:[%s3522_s3 + $0x27c] ss:$28 sps:$4 sm:$0xff]  }
 0x10d   :  { %v2618_v44 = vld [vmem:[%s3522_s3 + $0x630] ss:$28 sps:$4 sm:$0xff]  }
 0x10f   :  { %1745 = vmatpush2.bf16.msra.mxu0 %v2537_v48  ;;  %1786 = vmatpush2.bf16.msra.mxu1 %v2540_v50  ;;  %v2626_v48 = vld [vmem:[%s3522_s3 + $0x5fc] ss:$28 sps:$4 sm:$0xff]  }
 0x110   :  { %1746 = vmatprep.subr.bf16.mxu0 %v2545_v51  ;;  %1787 = vmatprep.subr.bf16.mxu1 %v2548_v52  ;;  %v2621_v50 = vld [vmem:[%s3522_s3 + $0x278] ss:$28 sps:$4 sm:$0xff]   ;;  %v2629_v52 = vld [vmem:[%s3522_s3 + $0x244] ss:$28 sps:$4 sm:$0xff]  }
 0x111   :  { %v2624_v51 = vld [vmem:[%s3522_s3 + $0x5f8] ss:$28 sps:$4 sm:$0xff]  }
 0x113   :  { %1747 = vmatpush2.bf16.msra.mxu0 %v2543_v53  ;;  %1788 = vmatpush2.bf16.msra.mxu1 %v2546_v54  ;;  %v2632_v53 = vld [vmem:[%s3522_s3 + $0x5c4] ss:$28 sps:$4 sm:$0xff]  }
 0x114   :  { %1798 = vmatprep.subr.bf16.mxu0 %v2551_v55  ;;  %1839 = vmatprep.subr.bf16.mxu1 %v2554_v56  ;;  %v2627_v54 = vld [vmem:[%s3522_s3 + $0x240] ss:$28 sps:$4 sm:$0xff]   ;;  %v2635_v56 = vld [vmem:[%s3522_s3 + $0x20c] ss:$28 sps:$4 sm:$0xff]  }
 0x115   :  { %v2630_v55 = vld [vmem:[%s3522_s3 + $0x5c0] ss:$28 sps:$4 sm:$0xff]  }
 0x116   :  { %1749 = vmatmul.mubr.bf16.vlgmr.msra.gmra.mxu0 %v3007_v49  ;;  %1790 = vmatmul.mubr.bf16.vlgmr.msra.gmra.mxu1 %v2995_v42 }
 0x117   :  { %1799 = vmatpush1.bf16.msra.mxu0 %v2549_v57  ;;  %1830 = vmatprep.mubr.bf16.mxu0 %v2997_v45  ;;  %v2638_v57 = vld [vmem:[%s3522_s3 + $0x58c] ss:$28 sps:$4 sm:$0xff]  }
 0x118   :  { %1840 = vmatpush1.bf16.msra.mxu1 %v2552_v58  ;;  %1871 = vmatprep.mubr.bf16.mxu1 %v2999_v46  ;;  %v2633_v58 = vld [vmem:[%s3522_s3 + $0x208] ss:$28 sps:$4 sm:$0xff]  }
 0x119   :  { %1800 = vmatprep.subr.bf16.mxu0 %v2557_v59  ;;  %1841 = vmatprep.subr.bf16.mxu1 %v2560_v60  ;;  %v2636_v59 = vld [vmem:[%s3522_s3 + $0x588] ss:$28 sps:$4 sm:$0xff]   ;;  %v2641_v60 = vld [vmem:[%s3522_s3 + $0x1d4] ss:$28 sps:$4 sm:$0xff]  }
 0x11b   :  { %1801 = vmatpush1.bf16.msra.mxu0 %v2555_v61  ;;  %v2644_v61 = vld [vmem:[%s3522_s3 + $0x554] ss:$28 sps:$4 sm:$0xff]  }
 0x11c   :  { %1842 = vmatpush1.bf16.msra.mxu1 %v2558_v62  ;;  %1802 = vmatprep.subr.bf16.mxu0 %v2563_v63  ;;  %v2639_v62 = vld [vmem:[%s3522_s3 + $0x1d0] ss:$28 sps:$4 sm:$0xff]  }
 0x11d   :  { %1843 = vmatprep.subr.bf16.mxu1 %v2566_v0  ;;  %v2642_v63 = vld [vmem:[%s3522_s3 + $0x550] ss:$28 sps:$4 sm:$0xff]   ;;  %v2645_v0 = vld [vmem:[%s3522_s3 + $0x360] ss:$28 sps:$4 sm:$0xff]  }
 0x11f   :  { %1803 = vmatpush1.bf16.msra.mxu0 %v2561_v1  ;;  %v2646_v1 = vld [vmem:[%s3522_s3 + $0x6e0] ss:$28 sps:$4 sm:$0xff]  }
 0x120   :  { %1844 = vmatpush1.bf16.msra.mxu1 %v2564_v2  ;;  %1804 = vmatprep.subr.bf16.mxu0 %v2569_v3  ;;  %v2647_v2 = vld [vmem:[%s3522_s3 + $0x1a0] ss:$28 sps:$4 sm:$0xff]  }
 0x121   :  { %1845 = vmatprep.subr.bf16.mxu1 %v2572_v4  ;;  %v2648_v3 = vld [vmem:[%s3522_s3 + $0x520] ss:$28 sps:$4 sm:$0xff]   ;;  %v2649_v4 = vld [vmem:[%s3522_s3 + $0x328] ss:$28 sps:$4 sm:$0xff]  }
 0x123   :  { %1805 = vmatpush1.bf16.msra.mxu0 %v2567_v5  ;;  %v2650_v5 = vld [vmem:[%s3522_s3 + $0x6a8] ss:$28 sps:$4 sm:$0xff]  }
 0x124   :  { %1846 = vmatpush1.bf16.msra.mxu1 %v2570_v6  ;;  %1806 = vmatprep.subr.bf16.mxu0 %v2575_v7  ;;  %v2651_v6 = vld [vmem:[%s3522_s3 + $0x168] ss:$28 sps:$4 sm:$0xff]  }
 0x125   :  { %1847 = vmatprep.subr.bf16.mxu1 %v2578_v8  ;;  %v2652_v7 = vld [vmem:[%s3522_s3 + $0x4e8] ss:$28 sps:$4 sm:$0xff]   ;;  %v2653_v8 = vld [vmem:[%s3522_s3 + $0x2f0] ss:$28 sps:$4 sm:$0xff]  }
 0x127   :  { %1807 = vmatpush1.bf16.msra.mxu0 %v2573_v9  ;;  %v2654_v9 = vld [vmem:[%s3522_s3 + $0x670] ss:$28 sps:$4 sm:$0xff]  }
 0x128   :  { %1848 = vmatpush1.bf16.msra.mxu1 %v2576_v10  ;;  %1808 = vmatprep.subr.bf16.mxu0 %v2581_v11  ;;  %v2656_v10 = vld [vmem:[%s3522_s3 + $0x4b0] ss:$28 sps:$4 sm:$0xff]   ;;  %v2658_v11 = vld [vmem:[%s3522_s3 + $0x638] ss:$28 sps:$4 sm:$0xff]  }
 0x129   :  { %1849 = vmatprep.subr.bf16.mxu1 %v2584_v12  ;;  %v2659_v12 = vld [vmem:[%s3522_s3 + $0xf8] ss:$28 sps:$4 sm:$0xff]  }
 0x12b   :  { %1809 = vmatpush1.bf16.msra.mxu0 %v2579_v13  ;;  %v2660_v13 = vld [vmem:[%s3522_s3 + $0x478] ss:$28 sps:$4 sm:$0xff]  }
 0x12c   :  { %1850 = vmatpush1.bf16.msra.mxu1 %v2582_v14  ;;  %1810 = vmatprep.subr.bf16.mxu0 %v2587_v15  ;;  %v2661_v14 = vld [vmem:[%s3522_s3 + $0x280] ss:$28 sps:$4 sm:$0xff]  }
 0x12d   :  { %1851 = vmatprep.subr.bf16.mxu1 %v2590_v16  ;;  %v2662_v15 = vld [vmem:[%s3522_s3 + $0x600] ss:$28 sps:$4 sm:$0xff]  }
 0x12e   :  { %v2663_v16 = vld [vmem:[%s3522_s3 + $0xc0] ss:$28 sps:$4 sm:$0xff]  }
 0x12f   :  { %1811 = vmatpush1.bf16.msra.mxu0 %v2585_v17  ;;  %v2664_v17 = vld [vmem:[%s3522_s3 + $0x440] ss:$28 sps:$4 sm:$0xff]  }
 0x130   :  { %1852 = vmatpush1.bf16.msra.mxu1 %v2588_v21  ;;  %1812 = vmatprep.subr.bf16.mxu0 %v2593_v24  ;;  %v2665_v21 = vld [vmem:[%s3522_s3 + $0x248] ss:$28 sps:$4 sm:$0xff]  }
 0x131   :  { %1853 = vmatprep.subr.bf16.mxu1 %v2596_v25  ;;  %v2666_v24 = vld [vmem:[%s3522_s3 + $0x5c8] ss:$28 sps:$4 sm:$0xff]  }
 0x132   :  { %v2667_v25 = vld [vmem:[%s3522_s3 + $0x88] ss:$28 sps:$4 sm:$0xff]  }
 0x133   :  { %1813 = vmatpush1.bf16.msra.mxu0 %v2591_v26  ;;  %v2668_v26 = vld [vmem:[%s3522_s3 + $0x408] ss:$28 sps:$4 sm:$0xff]  }
 0x134   :  { %1854 = vmatpush1.bf16.msra.mxu1 %v2594_v27  ;;  %1814 = vmatprep.subr.bf16.mxu0 %v2599_v28  ;;  %v2669_v27 = vld [vmem:[%s3522_s3 + $0x210] ss:$28 sps:$4 sm:$0xff]  }
 0x135   :  { %1855 = vmatprep.subr.bf16.mxu1 %v2602_v29  ;;  %v2670_v28 = vld [vmem:[%s3522_s3 + $0x590] ss:$28 sps:$4 sm:$0xff]  }
 0x136   :  { %v2671_v29 = vld [vmem:[%s3522_s3 + $0x50] ss:$28 sps:$4 sm:$0xff]  }
 0x137   :  { %1815 = vmatpush2.bf16.msra.mxu0 %v2597_v30  ;;  %v2672_v30 = vld [vmem:[%s3522_s3 + $0x3d0] ss:$28 sps:$4 sm:$0xff]  }
 0x138   :  { %1856 = vmatpush2.bf16.msra.mxu1 %v2600_v31  ;;  %1816 = vmatprep.subr.bf16.mxu0 %v2605_v32  ;;  %v2673_v31 = vld [vmem:[%s3522_s3 + $0x1d8] ss:$28 sps:$4 sm:$0xff]  }
 0x139   :  { %1857 = vmatprep.subr.bf16.mxu1 %v2608_v33  ;;  %v2674_v32 = vld [vmem:[%s3522_s3 + $0x558] ss:$28 sps:$4 sm:$0xff]  }
 0x13a   :  { %v2675_v33 = vld [vmem:[%s3522_s3 + $0x18] ss:$28 sps:$4 sm:$0xff]  }
 0x13b   :  { %1817 = vmatpush2.bf16.msra.mxu0 %v2603_v34  ;;  %v2676_v34 = vld [vmem:[%s3522_s3 + $0x398] ss:$28 sps:$4 sm:$0xff]  }
 0x13c   :  { %1858 = vmatpush2.bf16.msra.mxu1 %v2606_v35  ;;  %1818 = vmatprep.subr.bf16.mxu0 %v2611_v36  ;;  %v3496_v35 = vld [vmem:[%s3523_s4] sm:$0x7f] }
 0x13d   :  { %1859 = vmatprep.subr.bf16.mxu1 %v2614_v37  ;;  %v450_v36 = vrot.slane %v3496_v35, %v34_v19  ;;  %v454_v37 = vrot.slane %v3496_v35, %v38_v22 }
 0x13f   :  { %1819 = vmatpush2.bf16.msra.mxu0 %v2609_v38 }
 0x140   :  { %1860 = vmatpush2.bf16.msra.mxu1 %v2612_v39  ;;  %1820 = vmatprep.subr.bf16.mxu0 %v2617_v40 }
 0x141   :  { %1861 = vmatprep.subr.bf16.mxu1 %v2620_v41 }
 0x143   :  { %1821 = vmatpush2.bf16.msra.mxu0 %v2615_v43 }
 0x144   :  { %1862 = vmatpush2.bf16.msra.mxu1 %v2618_v44  ;;  %1822 = vmatprep.subr.bf16.mxu0 %v2623_v47 }
 0x145   :  { %1863 = vmatprep.subr.bf16.mxu1 %v2626_v48 }
 0x147   :  { %1823 = vmatpush2.bf16.msra.mxu0 %v2621_v50 }
 0x148   :  { %1864 = vmatpush2.bf16.msra.mxu1 %v2624_v51  ;;  %1824 = vmatprep.subr.bf16.mxu0 %v2629_v52 }
 0x149   :  { %1865 = vmatprep.subr.bf16.mxu1 %v2632_v53 }
 0x14b   :  { %1825 = vmatpush2.bf16.msra.mxu0 %v2627_v54 }
 0x14c   :  { %1866 = vmatpush2.bf16.msra.mxu1 %v2630_v55  ;;  %1826 = vmatprep.subr.bf16.mxu0 %v2635_v56 }
 0x14d   :  { %1867 = vmatprep.subr.bf16.mxu1 %v2638_v57 }
 0x14f   :  { %1827 = vmatpush2.bf16.msra.mxu0 %v2633_v58 }
 0x150   :  { %1868 = vmatpush2.bf16.msra.mxu1 %v2636_v59  ;;  %1828 = vmatprep.subr.bf16.mxu0 %v2641_v60  ;;  %v458_v59 = vrot.slane %v3496_v35, %v42_v20  ;;  %v462_v60 = vrot.slane %v3496_v35, %v46_v23 }
 0x151   :  { %1869 = vmatprep.subr.bf16.mxu1 %v2644_v61 }
 0x153   :  { %1829 = vmatpush2.bf16.msra.mxu0 %v2639_v62 }
 0x154   :  { %1870 = vmatpush2.bf16.msra.mxu1 %v2642_v63  ;;  %2301 = vmatprep.subr.bf16.mxu0 %v2645_v0 }
 0x155   :  { %2323 = vmatprep.subr.bf16.mxu1 %v2646_v1 }
 0x156   :  { %1831 = vmatmul.mubr.bf16.vlgmr.msra.gmra.mxu0 %v3007_v49 }
 0x157   :  { %1872 = vmatmul.mubr.bf16.vlgmr.msra.gmra.mxu1 %v2995_v42  ;;  %2302 = vmatpush3.bf16.msra.mxu0 %v2647_v2 }
 0x158   :  { %1912 = vmatprep.mubr.bf16.mxu0 %v2997_v45  ;;  %2324 = vmatpush3.bf16.msra.mxu1 %v2648_v3  ;;  %v2655_v45 = vld [vmem:[%s3522_s3 + $0x130] ss:$28 sps:$4 sm:$0xff]  }
 0x159   :  { %1952 = vmatprep.mubr.bf16.mxu1 %v2999_v46  ;;  %2303 = vmatprep.subr.bf16.mxu0 %v2649_v4  ;;  %v2657_v46 = vld [vmem:[%s3522_s3 + $0x2b8] ss:$28 sps:$4 sm:$0xff]   ;;  %s2728_s3 = smov [#allocation2]  }
 0x15a   :  { %2325 = vmatprep.subr.bf16.mxu1 %v2650_v5  ;;  %s2042_s4 = sshll.u32 %s2728_s3, 4  ;;  %s2043_s4 = int_to_ptr.vmem [resolvable:$true] %s2042_s4 }
 0x15b   :  { %2304 = vmatpush3.bf16.msra.mxu0 %v2651_v6  ;;  %s2705_s13 = scalar_lea.vmem %s2043_s4, 448  ;;  %p2710_p1 = scmp.lt.s32.totalorder %s2043_s4, %s2043_s4 }
 0x15c   :  { %2326 = vmatpush3.bf16.msra.mxu1 %v2652_v7  ;;  %2305 = vmatprep.subr.bf16.mxu0 %v2653_v8  ;;  %p2706_p0 = scmp.ne.s32.totalorder %s2043_s4, %s2705_s13  ;;  %p2711_p2 = scmp.lt.s32.totalorder %s2705_s13, %s2705_s13 }
 0x15d   :  { %2327 = vmatprep.subr.bf16.mxu1 %v2654_v9 }
 0x15e   :  { %p2712_p3 = por %p2711_p2, %p2710_p1 }
 0x15f   :  { %2306 = vmatpush3.bf16.msra.mxu0 %v2655_v45 }
 0x160   :  { %2328 = vmatpush3.bf16.msra.mxu1 %v2656_v10  ;;  %2307 = vmatprep.subr.bf16.mxu0 %v2657_v46  ;;  %p2713_p4 = pnand %p2712_p3, %p2706_p0 }
 0x161   :  { %2329 = vmatprep.subr.bf16.mxu1 %v2658_v11 }
 0x163   :  { %2308 = vmatpush3.bf16.msra.mxu0 %v2659_v12 }
 0x164   :  { %2330 = vmatpush3.bf16.msra.mxu1 %v2660_v13  ;;  %2309 = vmatprep.subr.bf16.mxu0 %v2661_v14  ;;  %v465_v14 = vsub.s32 4, %v2978_v18 }
 0x165   :  { %2331 = vmatprep.subr.bf16.mxu1 %v2662_v15  ;;  %v469_v15 = vsub.s32 5, %v2978_v18 }
 0x167   :  { %2310 = vmatpush3.bf16.msra.mxu0 %v2663_v16  ;;  %v466_v16 = vrot.slane %v3496_v35, %v465_v14 }
 0x168   :  { %2332 = vmatpush3.bf16.msra.mxu1 %v2664_v17  ;;  %2311 = vmatprep.subr.bf16.mxu0 %v2665_v21  ;;  %v470_v17 = vrot.slane %v3496_v35, %v469_v15 }
 0x169   :  { %2333 = vmatprep.subr.bf16.mxu1 %v2666_v24 }
 0x16b   :  { %2312 = vmatpush3.bf16.msra.mxu0 %v2667_v25 }
 0x16c   :  { %2334 = vmatpush3.bf16.msra.mxu1 %v2668_v26  ;;  %2313 = vmatprep.subr.bf16.mxu0 %v2669_v27 }
 0x16d   :  { %2335 = vmatprep.subr.bf16.mxu1 %v2670_v28 }
 0x16f   :  { %2314 = vmatpush3.bf16.msra.mxu0 %v2671_v29 }
 0x170   :  { %2336 = vmatpush3.bf16.msra.mxu1 %v2672_v30  ;;  %2315 = vmatprep.subr.bf16.mxu0 %v2673_v31 }
 0x171   :  { %2337 = vmatprep.subr.bf16.mxu1 %v2674_v32 }
 0x173   :  { %2316 = vmatpush3.bf16.msra.mxu0 %v2675_v33 }
 0x174   :  { %2338 = vmatpush3.bf16.msra.mxu1 %v2676_v34 }
 0x176   :  { %1913 = vmatmul.mubr.bf16.vlgmr.msra.gmra.mxu0 %v3007_v49 }
 0x177   :  { %1953 = vmatmul.mubr.bf16.vlgmr.msra.gmra.mxu1 %v2995_v42 }
 0x196   :  { %v1668_v38 = vpop.f32.mrf.mxu0  ;;  %v1709_v39 = vpop.f32.mrf.mxu1 }
 0x197   :  { %v1669_v40 = vadd.f32 %v1668_v38, %v450_v36 }
 0x198   :  { %v1670_v41 = vpop.f32.mrf.mxu0  ;;  %v1711_v49 = vpop.f32.mrf.mxu1 }
 0x199   :  { %v1710_v43 = vadd.f32 %v1709_v39, %v1669_v40  ;;  %v1671_v42 = vadd.f32 %v1670_v41, %v454_v37 }
 0x19a   :  { %v1672_v44 = vpop.f32.mrf.mxu0  ;;  %v1713_v47 = vpop.f32.mrf.mxu1 }
 0x19b   :  { %v2286_v48 = vmul.f32 -1.442695, %v1710_v43  ;;  %v1712_v50 = vadd.f32 %v1711_v49, %v1671_v42  ;;  %v473_v49 = vsub.s32 6, %v2978_v18 }
 0x19c   :  { %v1673_v51 = vpop.f32.mrf.mxu0  ;;  %v1714_v52 = vpop.f32.mrf.mxu1 }
 0x19d   :  { %2677 = vpow2.f32 %v2286_v48  ;;  %v2287_v53 = vmul.f32 -1.442695, %v1712_v50  ;;  %v474_v44 = vrot.slane %v3496_v35, %v473_v49 }
 0x19f   :  { %2679 = vpow2.f32 %v2287_v53 }
 0x1aa   :  { %v2678_v19 = vpop.eup %2677 }
 0x1ab   :  { %v1981_v54 = vadd.f32 1.0, %v2678_v19 }
 0x1ac   :  { %v2680_v55 = vpop.eup %2679 }
 0x1ad   :  { %v1982_v22 = vadd.f32 1.0, %v2680_v55  ;;  %2681 = vrcp.f32 %v1981_v54 }
 0x1af   :  { %2683 = vrcp.f32 %v1982_v22 }
 0x1ba   :  { %v2682_v56 = vpop.eup %2681 }
 0x1bc   :  { %v2684_v57 = vpop.eup %2683 }
 0x1bd   :  { %v2297_v58 = vpack.c.bf16 %v2684_v57, %v2682_v56 }
 0x1bf   :  { %2031 = vst [vmem:[#allocation2] sm:$0xff] %v2297_v58 }
 0x1d6   :  { %v1750_v61 = vpop.f32.mrf.mxu0  ;;  %v1791_v62 = vpop.f32.mrf.mxu1 }
 0x1d7   :  { %v1751_v63 = vadd.f32 %v1750_v61, %v458_v59 }
 0x1d8   :  { %v1752_v0 = vpop.f32.mrf.mxu0  ;;  %v1793_v1 = vpop.f32.mrf.mxu1 }
 0x1d9   :  { %v1792_v2 = vadd.f32 %v1791_v62, %v1751_v63  ;;  %v1753_v3 = vadd.f32 %v1752_v0, %v462_v60 }
 0x1da   :  { %v1754_v4 = vpop.f32.mrf.mxu0  ;;  %v1795_v5 = vpop.f32.mrf.mxu1 }
 0x1db   :  { %v2288_v6 = vmul.f32 -1.442695, %v1792_v2  ;;  %v1794_v7 = vadd.f32 %v1793_v1, %v1753_v3 }
 0x1dc   :  { %v1755_v8 = vpop.f32.mrf.mxu0  ;;  %v1796_v9 = vpop.f32.mrf.mxu1 }
 0x1dd   :  { %2685 = vpow2.f32 %v2288_v6  ;;  %v2289_v45 = vmul.f32 -1.442695, %v1794_v7 }
 0x1df   :  { %2687 = vpow2.f32 %v2289_v45 }
 0x1ea   :  { %v2686_v20 = vpop.eup %2685 }
 0x1eb   :  { %v1983_v10 = vadd.f32 1.0, %v2686_v20 }
 0x1ec   :  { %v2688_v46 = vpop.eup %2687 }
 0x1ed   :  { %v1984_v23 = vadd.f32 1.0, %v2688_v46  ;;  %2689 = vrcp.f32 %v1983_v10 }
 0x1ef   :  { %2691 = vrcp.f32 %v1984_v23 }
 0x1fa   :  { %v2690_v11 = vpop.eup %2689 }
 0x1fc   :  { %v2692_v12 = vpop.eup %2691 }
 0x1fd   :  { %v2298_v13 = vpack.c.bf16 %v2692_v12, %v2690_v11 }
 0x1ff   :  { %2032 = vst [vmem:[#allocation2 + $0x8] sm:$0xff] %v2298_v13 }
 0x216   :  { %v1832_v21 = vpop.f32.mrf.mxu0 }
 0x217   :  { %v1833_v24 = vadd.f32 %v1832_v21, %v466_v16  ;;  %v1873_v25 = vpop.f32.mrf.mxu1 }
 0x218   :  { %v1834_v26 = vpop.f32.mrf.mxu0 }
 0x219   :  { %v1874_v27 = vadd.f32 %v1873_v25, %v1833_v24  ;;  %v1835_v28 = vadd.f32 %v1834_v26, %v470_v17  ;;  %v1875_v29 = vpop.f32.mrf.mxu1 }
 0x21a   :  { %v1836_v30 = vpop.f32.mrf.mxu0 }
 0x21b   :  { %v2290_v31 = vmul.f32 -1.442695, %v1874_v27  ;;  %v1876_v32 = vadd.f32 %v1875_v29, %v1835_v28  ;;  %v1877_v33 = vpop.f32.mrf.mxu1 }
 0x21c   :  { %v1837_v34 = vpop.f32.mrf.mxu0 }
 0x21d   :  { %2693 = vpow2.f32 %v2290_v31  ;;  %v2291_v36 = vmul.f32 -1.442695, %v1876_v32  ;;  %v1878_v37 = vpop.f32.mrf.mxu1 }
 0x21f   :  { %2695 = vpow2.f32 %v2291_v36 }
 0x22a   :  { %v2694_v38 = vpop.eup %2693 }
 0x22b   :  { %v1985_v39 = vadd.f32 1.0, %v2694_v38 }
 0x22c   :  { %v2696_v40 = vpop.eup %2695 }
 0x22d   :  { %v1986_v41 = vadd.f32 1.0, %v2696_v40  ;;  %2697 = vrcp.f32 %v1985_v39 }
 0x22f   :  { %2699 = vrcp.f32 %v1986_v41 }
 0x236   :  { %v2317_v43 = vpop.f32.mrf.mxu0 }
 0x237   :  { %v2339_v42 = vpop.f32.mrf.mxu1 }
 0x238   :  { %v2318_v47 = vpop.f32.mrf.mxu0 }
 0x239   :  { %v2319_v48 = vadd.f32 %v2318_v47, %v2317_v43  ;;  %v2340_v50 = vpop.f32.mrf.mxu1 }
 0x23a   :  { %v2320_v51 = vpop.f32.mrf.mxu0  ;;  %v2698_v52 = vpop.eup %2697  ;;  %v2341_v19 = vadd.f32 %v2340_v50, %v2339_v42 }
 0x23b   :  { %v1915_v53 = vadd.f32 %v2319_v48, %v474_v44  ;;  %v2342_v54 = vpop.f32.mrf.mxu1 }
 0x23c   :  { %v2700_v55 = vpop.eup %2699  ;;  %v2321_v22 = vpop.f32.mrf.mxu0 }
 0x23d   :  { %v1955_v56 = vadd.f32 %v2341_v19, %v1915_v53  ;;  %v2343_v57 = vpop.f32.mrf.mxu1  ;;  %v2299_v58 = vpack.c.bf16 %v2700_v55, %v2698_v52 }
 0x23f   :  { %v2292_v59 = vmul.f32 -1.442695, %v1955_v56  ;;  %2033 = vst [vmem:[#allocation2 + $0x10] sm:$0xff] %v2299_v58 }
 0x241   :  { %2701 = vpow2.f32 %v2292_v59 }
 0x24e   :  { %v2702_v18 = vpop.eup %2701 }
 0x24f   :  { %v1987_v60 = vadd.f32 1.0, %v2702_v18 }
 0x251   :  { %2703 = vrcp.f32 %v1987_v60 }
 0x25e   :  { %v2704_v35 = vpop.eup %2703 }
 0x25f   :  { %v2300_v61 = vpack.c.bf16 %v2704_v35, %v2704_v35 }
 0x261   :  { %2035 = vst.msk [vmem:[#allocation2 + $0x18] sm:$0xf] %vm2034_vm2, %v2300_v61 }
 0x262   :  { %2716 = shalt.err (!%p2713_p4)
}
 0x263   :  { %2045 = dma.vmem_to_hbm [thread:$0]  %s2043_s4, 448, %s3524_s5, [#allocation3]  }
 0x264   :  { %2725 = dma.done.wait [#allocation3], 448  }
 0x265   :  { %2726 = vsyncadd [#allocation3], 4294966848 }
 0x266   :  { %2049 = vsyncpa [#allocation3], 1 }

</bundles_post_ra>
